<compile_context>
chip_gen: v7x
topology: tpu7x:2x2x1
jax: 0.10.0
libtpu: 0.0.40
codegen_flags: <defaults>
</compile_context>

<pallas_src>
import functools

import jax
import jax.numpy as jnp
from jax import lax
from jax.experimental import pallas as pl
from jax.experimental.pallas import tpu as pltpu

NEG_BIG = -1e30  # finite stand-in for -inf (never use -inf: inf - inf -> NaN)


def _round_up(v, m):
    return ((v + m - 1) // m) * m


def _cdiv(a, b):
    return -(-a // b)


def wsddn_kernel(pooled_ref, rmask_ref, w_ref, b_ref, out_ref, *,
                 num_classes, bblk, smax, wp, packed_heads):
    # pooled_ref : VMEM (bblk, smax, C)   pooled features (padded rows = 0)
    # rmask_ref  : VMEM (bblk, smax, 1)   0 for valid boxes / NEG_BIG for padding
    # w_ref      : VMEM (C, WP)           fused [cls | det] weights
    # b_ref      : VMEM (1, WP)           fused bias
    # out_ref    : VMEM (bblk, smax, OUTW)
    c = pooled_ref.shape[-1]

    # Single batched MXU matmul for all Bblk*Smax boxes of this step.
    x2d = pooled_ref[...].reshape(bblk * smax, c)
    logits = jnp.dot(x2d, w_ref[...], preferred_element_type=jnp.float32)
    logits = (logits + b_ref[...]).reshape(bblk, smax, wp)
    rmask = rmask_ref[...]                                # (bblk, smax, 1)

    if packed_heads:
        # cls in lanes [0, K), det in lanes [K, 2K); lanes >= 2K are padding.
        lane = lax.broadcasted_iota(jnp.int32, (1, 1, wp), 2)
        is_cls = lane < num_classes
        cls_m = jnp.where(is_cls, logits, NEG_BIG)
        det = logits
    else:
        # Two 128-aligned halves; padded cls lanes already NEG_BIG via bias.
        kp = wp // 2
        cls_m = logits[..., :kp]
        det = logits[..., kp:]

    # ---- class log_softmax over lanes (torch dim=1), per box row ----
    cmax = jnp.max(cls_m, axis=-1, keepdims=True)
    cls_ls = cls_m - cmax - jnp.log(
        jnp.sum(jnp.exp(cls_m - cmax), axis=-1, keepdims=True))

    # ---- per-image log_softmax over boxes (torch dim=0), per class lane ----
    det_m = det + rmask                                   # padded rows -> ~NEG_BIG
    dmax = jnp.max(det_m, axis=1, keepdims=True)          # (bblk, 1, WP)
    det_ls = det_m - dmax - jnp.log(
        jnp.sum(jnp.exp(det_m - dmax), axis=1, keepdims=True))

    if packed_heads:
        # cls_ls stays in lanes [0,K), det_ls in lanes [K,2K); the wrapper adds
        # the two K-wide slices (avoids an in-kernel cross-lane roll).
        out_ref[...] = jnp.where(is_cls, cls_ls, det_ls)
    else:
        out_ref[...] = cls_ls + det_ls


def _vmem_limit_bytes():
    cap = None
    try:
        cap = getattr(pltpu.get_tpu_info(), "vmem_capacity_bytes", None)
    except Exception:
        cap = None
    if not cap:
        cap = 64 * 1024 * 1024          # v7x-safe fallback
    # ~48 MiB on v7x (64 MiB physical), ~96 MiB on v5e/v6e (128 MiB physical).
    return min(int(cap * 0.75), 100 * 1024 * 1024)


def _choose_bblk(batch, smax, c, wp, outw, vmem_limit):
    # Per-image VMEM: double-buffered input / rmask / output blocks plus ~3
    # f32 logits-sized live intermediates (logits, cls_ls, det_ls).
    per_img = 4 * (2 * smax * c + 2 * smax + 2 * smax * outw + 3 * smax * wp)
    # Resident weight + bias (double-buffered by the default pipeline).
    # (pipeline_mode=pl.Buffered(1) could single-buffer them; left default as
    #  the packed head keeps them small.)
    fixed = 4 * (2 * c * wp + 2 * wp)
    avail = int(vmem_limit * 0.8) - fixed
    cap = max(1, avail // per_img)
    want = max(1, _cdiv(batch, 2))      # keep >= 2 grid steps for v7x's 2 TCs
    return int(max(1, min(want, cap)))


@functools.partial(jax.jit, static_argnames=("num_box_per_img",))
def wsddn_predictor(x, wc, bc, wd, bd, num_box_per_img):
    """x: (N, C, H, W) f32; wc/wd: (K, C) torch Linear weights; bc/bd: (K,)."""
    N, C, H, W = x.shape
    K = wc.shape[0]
    B = len(num_box_per_img)

    packed_heads = (2 * K) <= 128
    KP = _round_up(K, 128)
    WP = 128 if packed_heads else 2 * KP      # fused-head lane width
    OUTW = 128 if packed_heads else KP        # kernel output lane width
    Smax = _round_up(max(max(num_box_per_img), 1), 8)

    vmem_limit = _vmem_limit_bytes()
    bblk = _choose_bblk(B, Smax, C, WP, OUTW, vmem_limit)
    G = _cdiv(B, bblk)
    Bpad = G * bblk

    # The in-kernel (bblk, Smax, C) -> (bblk*Smax, C) view is a pure retile
    # only when the feature axis is lane-aligned; zero-pad C when batching.
    Cp = C if (bblk == 1 or C % 128 == 0) else _round_up(C, 128)

    # AdaptiveAvgPool2d(1) + flatten on an (N, C, H*W) view.
    pooled = jnp.mean(x.reshape(N, C, H * W), axis=-1)           # (N, C)

    # Pack contiguous per-image segments (static sizes) into (Bpad, Smax, Cp).
    segs = []
    start = 0
    for n in num_box_per_img:
        seg = pooled[start:start + n]
        segs.append(jnp.pad(seg, ((0, Smax - n), (0, Cp - C))))
        start += n
    packed = jnp.stack(segs, axis=0)                             # (B, Smax, Cp)
    if Bpad > B:
        packed = jnp.pad(packed, ((0, Bpad - B), (0, 0), (0, 0)))

    # Additive row-validity mask: 0 for real boxes, NEG_BIG for padded rows.
    lens = jnp.asarray(tuple(num_box_per_img) + (0,) * (Bpad - B),
                       jnp.int32)[:, None]                       # (Bpad, 1)
    rmask = jnp.where(jnp.arange(Smax)[None, :] < lens, 0.0, NEG_BIG)
    rmask = rmask.astype(jnp.float32)[..., None]                 # (Bpad, Smax, 1)

    # Fused head weights / bias.
    wcat = jnp.zeros((Cp, WP), jnp.float32)
    bcat = jnp.zeros((1, WP), jnp.float32)
    if packed_heads:
        wcat = wcat.at[:C, :K].set(wc.T).at[:C, K:2 * K].set(wd.T)
        bcat = bcat.at[0, :K].set(bc).at[0, K:2 * K].set(bd)
    else:
        wcat = wcat.at[:C, :K].set(wc.T).at[:C, KP:KP + K].set(wd.T)
        # Padded cls bias lanes carry NEG_BIG so the kernel needs no class-lane
        # mask on this path (weight columns there are zero).
        bcat = bcat.at[0, :KP].set(NEG_BIG).at[0, :K].set(bc)
        bcat = bcat.at[0, KP:KP + K].set(bd)

    kernel = functools.partial(
        wsddn_kernel, num_classes=K, bblk=bblk, smax=Smax, wp=WP,
        packed_heads=packed_heads)

    out_packed = pl.pallas_call(
        kernel,
        out_shape=jax.ShapeDtypeStruct((Bpad, Smax, OUTW), jnp.float32),
        grid=(G,),
        in_specs=[
            pl.BlockSpec((bblk, Smax, Cp), lambda g: (g, 0, 0)),
            pl.BlockSpec((bblk, Smax, 1), lambda g: (g, 0, 0)),
            pl.BlockSpec((Cp, WP), lambda g: (0, 0)),   # resident weights
            pl.BlockSpec((1, WP), lambda g: (0, 0)),    # resident bias
        ],
        out_specs=pl.BlockSpec((bblk, Smax, OUTW), lambda g: (g, 0, 0)),
        compiler_params=pltpu.CompilerParams(
            dimension_semantics=("parallel",),          # image blocks independent
            vmem_limit_bytes=vmem_limit,
        ),
    )(packed, rmask, wcat, bcat)

    # Combine heads and drop padding (static slices).
    if packed_heads:
        combined = out_packed[..., :K] + out_packed[..., K:2 * K]
    else:
        combined = out_packed[..., :K]
    outs = [combined[b, :n, :] for b, n in enumerate(num_box_per_img)]
    return jnp.concatenate(outs, axis=0)                         # (N, K)


def wsddn_reference(x, wc, bc, wd, bd, num_box_per_img):
    """Pure-JAX reference mirroring the PyTorch module."""
    N, C, H, W = x.shape
    pooled = jnp.mean(x.reshape(N, C, H * W), axis=-1)
    cls = pooled @ wc.T + bc
    det = pooled @ wd.T + bd
    cls_ls = jax.nn.log_softmax(cls, axis=1)
    parts = []
    start = 0
    for n in num_box_per_img:
        parts.append(jax.nn.log_softmax(det[start:start + n], axis=0))
        start += n
    det_ls = jnp.concatenate(parts, axis=0)
    return cls_ls + det_ls


if __name__ == "__main__":
    key = jax.random.PRNGKey(0)

    # Small synthetic config: in_channels=32, num_classes=21 (VOC-like),
    # 4 images with (5, 3, 7, 2) proposals -> N = 17 boxes, 4x4 roi features.
    # With B=4 the wrapper picks Bblk=2, grid=2 (exercises the batched matmul
    # path while keeping two grid steps for v7x).
    in_channels = 32
    num_classes = 21
    num_box_per_img = (5, 3, 7, 2)
    N = sum(num_box_per_img)
    H = W = 4

    kx, kwc, kwd, kbc, kbd = jax.random.split(key, 5)
    x = jax.random.normal(kx, (N, in_channels, H, W), dtype=jnp.float32)

    # nn.init.normal_(weight, std=0.01); biases perturbed slightly so the
    # bias path is actually checked (module inits them to 0).
    wc = 0.01 * jax.random.normal(kwc, (num_classes, in_channels), jnp.float32)
    wd = 0.01 * jax.random.normal(kwd, (num_classes, in_channels), jnp.float32)
    bc = 0.01 * jax.random.normal(kbc, (num_classes,), jnp.float32)
    bd = 0.01 * jax.random.normal(kbd, (num_classes,), jnp.float32)

    out = wsddn_predictor(x, wc, bc, wd, bd, num_box_per_img)
    out = jax.block_until_ready(out)

    ref = wsddn_reference(x, wc, bc, wd, bd, num_box_per_img)
    assert out.shape == (N, num_classes)
    err = float(jnp.max(jnp.abs(out - ref)))
    assert err < 1e-4, f"max abs err = {err}"
    print("KERNEL_OK")
</pallas_src>

<mosaic_0001>
module attributes {stable_mosaic.version = 11 : i64} {
  func.func @wsddn_kernel(%arg0: i32, %arg1: memref<2x8x128xf32, #tpu.memory_space<vmem>>, %arg2: memref<2x8x1xf32, #tpu.memory_space<vmem>>, %arg3: memref<128x128xf32, #tpu.memory_space<vmem>>, %arg4: memref<1x128xf32, #tpu.memory_space<vmem>>, %arg5: memref<2x8x128xf32, #tpu.memory_space<vmem>>) attributes {dimension_semantics = [#tpu.dimension_semantics<parallel>], iteration_bounds = array<i64: 2>, scalar_prefetch = 0 : i64, scratch_operands = 0 : i64, tpu.core_type = #tpu.core_type<tc>, window_params = [{transform_indices = @transform_0, window_bounds = array<i64: 2, 8, 128>}, {transform_indices = @transform_1, window_bounds = array<i64: 2, 8, 1>}, {pipeline_mode = #tpu.pipeline_mode<synchronous>, transform_indices = @transform_2, window_bounds = array<i64: 128, 128>}, {pipeline_mode = #tpu.pipeline_mode<synchronous>, transform_indices = @transform_3, window_bounds = array<i64: 1, 128>}, {transform_indices = @transform_4, window_bounds = array<i64: 2, 8, 128>}]} {
    %c0 = arith.constant 0 : index
    %c0_0 = arith.constant 0 : index
    %c0_1 = arith.constant 0 : index
    %0 = vector.load %arg1[%c0, %c0_0, %c0_1] : memref<2x8x128xf32, #tpu.memory_space<vmem>>, vector<2x8x128xf32>
    %1 = vector.shape_cast %0 : vector<2x8x128xf32> to vector<16x128xf32>
    %c0_2 = arith.constant 0 : index
    %c0_3 = arith.constant 0 : index
    %2 = vector.load %arg3[%c0_2, %c0_3] : memref<128x128xf32, #tpu.memory_space<vmem>>, vector<128x128xf32>
    %cst = arith.constant dense<0.000000e+00> : vector<16x128xf32>
    %3 = tpu.matmul %1, %2, %cst {dimension_numbers = #tpu.dot_dimension_numbers<[1], [0], [0], [1], [0, 0, 1, 1], [], []>} : vector<16x128xf32>, vector<128x128xf32>, vector<16x128xf32> -> vector<16x128xf32>
    %c0_4 = arith.constant 0 : index
    %c0_5 = arith.constant 0 : index
    %4 = vector.load %arg4[%c0_4, %c0_5] : memref<1x128xf32, #tpu.memory_space<vmem>>, vector<1x128xf32>
    %5 = vector.broadcast %4 : vector<1x128xf32> to vector<16x128xf32>
    %6 = arith.addf %3, %5 : vector<16x128xf32>
    %7 = vector.shape_cast %6 : vector<16x128xf32> to vector<2x8x128xf32>
    %c0_6 = arith.constant 0 : index
    %c0_7 = arith.constant 0 : index
    %c0_8 = arith.constant 0 : index
    %8 = vector.load %arg2[%c0_6, %c0_7, %c0_8] : memref<2x8x1xf32, #tpu.memory_space<vmem>>, vector<2x8x1xf32>
    %9 = tpu.iota {dimensions = array<i32: 2>} : vector<1x1x128xi32>
    %c21_i32 = arith.constant 21 : i32
    %10 = vector.broadcast %c21_i32 : i32 to vector<1x1x128xi32>
    %11 = arith.cmpi slt, %9, %10 : vector<1x1x128xi32>
    %cst_9 = arith.constant -1.000000e+30 : f32
    %12 = vector.shape_cast %11 : vector<1x1x128xi1> to vector<1x1x128xi1>
    %13 = vector.broadcast %12 : vector<1x1x128xi1> to vector<2x8x128xi1>
    %14 = vector.broadcast %cst_9 : f32 to vector<2x8x128xf32>
    %15 = arith.select %13, %7, %14 : vector<2x8x128xi1>, vector<2x8x128xf32>
    %cst_10 = arith.constant dense<0xFF800000> : vector<2x8xf32>
    %16 = vector.multi_reduction <maximumf>, %15, %cst_10 [2] : vector<2x8x128xf32> to vector<2x8xf32>
    %17 = vector.shape_cast %16 : vector<2x8xf32> to vector<2x8x1xf32>
    %18 = vector.broadcast %17 : vector<2x8x1xf32> to vector<2x8x128xf32>
    %19 = arith.subf %15, %18 : vector<2x8x128xf32>
    %20 = vector.broadcast %17 : vector<2x8x1xf32> to vector<2x8x128xf32>
    %21 = arith.subf %15, %20 : vector<2x8x128xf32>
    %22 = math.exp %21 : vector<2x8x128xf32>
    %cst_11 = arith.constant dense<0.000000e+00> : vector<2x8xf32>
    %23 = vector.multi_reduction <add>, %22, %cst_11 [2] : vector<2x8x128xf32> to vector<2x8xf32>
    %24 = vector.shape_cast %23 : vector<2x8xf32> to vector<2x8x1xf32>
    %25 = math.log %24 : vector<2x8x1xf32>
    %26 = vector.broadcast %25 : vector<2x8x1xf32> to vector<2x8x128xf32>
    %27 = arith.subf %19, %26 : vector<2x8x128xf32>
    %28 = vector.broadcast %8 : vector<2x8x1xf32> to vector<2x8x128xf32>
    %29 = arith.addf %7, %28 : vector<2x8x128xf32>
    %cst_12 = arith.constant dense<0xFF800000> : vector<2x128xf32>
    %30 = vector.multi_reduction <maximumf>, %29, %cst_12 [1] : vector<2x8x128xf32> to vector<2x128xf32>
    %31 = vector.shape_cast %30 : vector<2x128xf32> to vector<2x1x128xf32>
    %32 = vector.broadcast %31 : vector<2x1x128xf32> to vector<2x8x128xf32>
    %33 = arith.subf %29, %32 : vector<2x8x128xf32>
    %34 = vector.broadcast %31 : vector<2x1x128xf32> to vector<2x8x128xf32>
    %35 = arith.subf %29, %34 : vector<2x8x128xf32>
    %36 = math.exp %35 : vector<2x8x128xf32>
    %cst_13 = arith.constant dense<0.000000e+00> : vector<2x128xf32>
    %37 = vector.multi_reduction <add>, %36, %cst_13 [1] : vector<2x8x128xf32> to vector<2x128xf32>
    %38 = vector.shape_cast %37 : vector<2x128xf32> to vector<2x1x128xf32>
    %39 = math.log %38 : vector<2x1x128xf32>
    %40 = vector.broadcast %39 : vector<2x1x128xf32> to vector<2x8x128xf32>
    %41 = arith.subf %33, %40 : vector<2x8x128xf32>
    %42 = vector.shape_cast %11 : vector<1x1x128xi1> to vector<1x1x128xi1>
    %43 = vector.broadcast %42 : vector<1x1x128xi1> to vector<2x8x128xi1>
    %44 = arith.select %43, %27, %41 : vector<2x8x128xi1>, vector<2x8x128xf32>
    %c0_14 = arith.constant 0 : index
    %c0_15 = arith.constant 0 : index
    %c0_16 = arith.constant 0 : index
    %45 = vector.load %arg5[%c0_14, %c0_15, %c0_16] : memref<2x8x128xf32, #tpu.memory_space<vmem>>, vector<2x8x128xf32>
    tpu.vector_store %arg5[%c0_14, %c0_15, %c0_16], %44 {strides = array<i32>} : memref<2x8x128xf32, #tpu.memory_space<vmem>>, vector<2x8x128xf32>,
    return
  }
  func.func @transform_0(%arg0: i32) -> (i32, i32, i32) {
    %c0_i32 = arith.constant 0 : i32
    %c0_i32_0 = arith.constant 0 : i32
    %c0_i32_1 = arith.constant 0 : i32
    return %arg0, %c0_i32, %c0_i32_0 : i32, i32, i32
  }
  func.func @transform_1(%arg0: i32) -> (i32, i32, i32) {
    %c0_i32 = arith.constant 0 : i32
    %c0_i32_0 = arith.constant 0 : i32
    %c0_i32_1 = arith.constant 0 : i32
    return %arg0, %c0_i32, %c0_i32_0 : i32, i32, i32
  }
  func.func @transform_2(%arg0: i32) -> (i32, i32) {
    %c0_i32 = arith.constant 0 : i32
    %c0_i32_0 = arith.constant 0 : i32
    %c0_i32_1 = arith.constant 0 : i32
    return %c0_i32, %c0_i32_0 : i32, i32
  }
  func.func @transform_3(%arg0: i32) -> (i32, i32) {
    %c0_i32 = arith.constant 0 : i32
    %c0_i32_0 = arith.constant 0 : i32
    %c0_i32_1 = arith.constant 0 : i32
    return %c0_i32, %c0_i32_0 : i32, i32
  }
  func.func @transform_4(%arg0: i32) -> (i32, i32, i32) {
    %c0_i32 = arith.constant 0 : i32
    %c0_i32_0 = arith.constant 0 : i32
    %c0_i32_1 = arith.constant 0 : i32
    return %arg0, %c0_i32, %c0_i32_0 : i32, i32, i32
  }
}

</mosaic_0001>

<bundles_post_ra>
// kernel: wsddn_predictor.1
= control target key start
LH: loop header
LB: loop body
LE: loop exit
PB: predicated region body
PF: predicated region fallthrough
CT: control target
= control target key end

     0   :  { %s632_s15 = smov 0   ;;  %s731_s0 = inlined_call_operand.vmem [shape: f32[4,8,128], index: 0, kind: input, shape index: {}]   ;;  %s732_s1 = inlined_call_operand.vmem [shape: f32[4,8,1], index: 1, kind: input, shape index: {}]   ;;  %s733_s2 = inlined_call_operand.vmem [shape: f32[128,128], index: 2, kind: input, shape index: {}]   ;;  %s734_s3 = inlined_call_operand.vmem [shape: f32[1,128], index: 3, kind: input, shape index: {}]   ;;  %s735_s4 = inlined_call_operand.vmem [shape: f32[4,8,128], index: 4, kind: output, shape index: {}]  }
   0x1 LB: > { %s472_s16 = sadd.s32 4294967295, %s604_s15   ;;  %p476_p0 = scmp.ge.s32.totalorder %s604_s15, 1  ;;  %s604_s15 = sphi %s632_s15, %s14_s15  }
   0x2   : > { %p174_p1 = scmp.lt.s32.totalorder %s604_s15, 3 }
   0x4   : > { %p175_p2 = pnand %p476_p0, %p174_p1 }
   0x5   : > { %v225_v0 = vld [vmem:[%s733_s2] sm:$0xff] (!%p175_p2)  ;;  %v226_v1 = vld [vmem:[%s733_s2 + $0x8] sm:$0xff] (!%p175_p2)  ;;  %v227_v2 = vld [vmem:[%s733_s2 + $0x10] sm:$0xff] (!%p175_p2)  ;;  %s477_s23 = sshll.u32 (!%p175_p2), %s472_s16, 1  ;;  %v606_v5 = vmov (!%p175_p2), 0   ;;  %v325_v29 = vlaneseq (!%p175_p2) }
   0x6   : > { %178 = sbr.rel (%p175_p2) target bundleno = 576 (0x240), region = 36  ;;  %v539_v3 = vpack.c.bf16 (!%p175_p2), %v226_v1, %v225_v0  ;;  %v228_v4 = vld [vmem:[%s733_s2 + $0x18] sm:$0xff] (!%p175_p2)  ;;  %p206_p3 = scmp.lt.s32.totalorder (!%p175_p2), %s477_s23, 3  ;;  %580 = vset.pattern.permute.xlu1 (!%p175_p2), %v606_v5  ;;  %581 = vset.pattern.permute.xlu0 (!%p175_p2), %v606_v5  ;;  %v229_v7 = vld [vmem:[%s733_s2 + $0x20] sm:$0xff] (!%p175_p2)  ;;  %v230_v8 = vld [vmem:[%s733_s2 + $0x28] sm:$0xff] (!%p175_p2) }
   0x7   : > { %v543_v6 = vpack.c.bf16 (!%p175_p2), %v228_v4, %v227_v2  ;;  %v547_v9 = vpack.c.bf16 (!%p175_p2), %v230_v8, %v229_v7  ;;  %v231_v10 = vld [vmem:[%s733_s2 + $0x30] sm:$0xff] (!%p175_p2)  ;;  %v232_v11 = vld [vmem:[%s733_s2 + $0x38] sm:$0xff] (!%p175_p2)  ;;  %v233_v15 = vld [vmem:[%s733_s2 + $0x40] sm:$0xff] (!%p175_p2)  ;;  %v702_v30 = vand.u32 (!%p175_p2), 127, %v325_v29 }
   0x8   : > { %540 = vmatprep.subr.bf16.mxu0 (!%p175_p2), %v539_v3  ;;  %v551_v14 = vpack.c.bf16 (!%p175_p2), %v232_v11, %v231_v10  ;;  %v234_v16 = vld [vmem:[%s733_s2 + $0x48] sm:$0xff] (!%p175_p2)  ;;  %v235_v19 = vld [vmem:[%s733_s2 + $0x50] sm:$0xff] (!%p175_p2)  ;;  %v236_v20 = vld [vmem:[%s733_s2 + $0x58] sm:$0xff] (!%p175_p2) }
   0x9   : > { %542 = vmatpush3.bf16.msra.mxu0 (!%p175_p2), %v539_v3  ;;  %v555_v18 = vpack.c.bf16 (!%p175_p2), %v234_v16, %v233_v15  ;;  %v559_v21 = vpack.c.bf16 (!%p175_p2), %v236_v20, %v235_v19  ;;  %v237_v22 = vld [vmem:[%s733_s2 + $0x60] sm:$0xff] (!%p175_p2)  ;;  %v238_v23 = vld [vmem:[%s733_s2 + $0x68] sm:$0xff] (!%p175_p2)  ;;  %v239_v25 = vld [vmem:[%s733_s2 + $0x70] sm:$0xff] (!%p175_p2)  ;;  %vm327_vm0 = vcmp.lt.s32.totalorder (!%p175_p2), %v702_v30, 21 }
   0xa   : > { %544 = vmatprep.subr.bf16.mxu0 (!%p175_p2), %v543_v6  ;;  %v563_v24 = vpack.c.bf16 (!%p175_p2), %v238_v23, %v237_v22  ;;  %v240_v26 = vld [vmem:[%s733_s2 + $0x78] sm:$0xff] (!%p175_p2)  ;;  %v483_v31 = vld [vmem:[%s734_s3] ss:$0 sm:$0xff] (!%p175_p2) }
   0xb   : > { %v567_v27 = vpack.c.bf16 (!%p175_p2), %v240_v26, %v239_v25 }
   0xd   : > { %s737_s23 = smov (!%p206_p3, %s477_s23), 3  ;;  %546 = vmatpush3.bf16.msra.mxu0 %v543_v6 }
   0xe   : > { %s658_s30 = sshll.u32 %s737_s23, 3  ;;  %548 = vmatprep.subr.bf16.mxu0 %v547_v9 }
   0xf   : > { %s670_s11 = scalar_lea.vmem %s731_s0, %s658_s30  ;;  %s215_s14 = scalar_lea.vmem %s732_s1, %s658_s30 }
  0x10   : > { %v223_v12 = vld [vmem:[%s670_s11] sm:$0xff]  ;;  %v324_v17 = vld [vmem:[%s215_s14 + $0x8] sm:$0xff] }
  0x11   : > { %536 = vmatprep.mubr.f32.mxu0 %v223_v12  ;;  %v323_v13 = vld [vmem:[%s215_s14] sm:$0xff]  ;;  %550 = vmatpush3.bf16.msra.mxu0 %v547_v9  ;;  %v224_v28 = vld [vmem:[%s670_s11 + $0x8] sm:$0xff]  ;;  %s221_s11 = scalar_lea.vmem %s735_s4, %s658_s30 }
  0x12   : > { %354 = vperm.xlu1 %580, %v323_v13   ;;  %552 = vmatprep.subr.bf16.mxu0 %v551_v14 }
  0x15   : > { %554 = vmatpush3.bf16.msra.mxu0 %v551_v14 }
  0x16   : > { %359 = vperm.xlu1 %580, %v324_v17   ;;  %556 = vmatprep.subr.bf16.mxu0 %v555_v18 }
  0x19   : > { %558 = vmatpush3.bf16.msra.mxu0 %v555_v18 }
  0x1a   : > { %560 = vmatprep.subr.bf16.mxu0 %v559_v21 }
  0x1d   : > { %562 = vmatpush3.bf16.msra.mxu0 %v559_v21 }
  0x1e   : > { %564 = vmatprep.subr.bf16.mxu0 %v563_v24 }
  0x21   : > { %566 = vmatpush3.bf16.msra.mxu0 %v563_v24 }
  0x22   : > { %568 = vmatprep.subr.bf16.mxu0 %v567_v27 }
  0x25   : > { %570 = vmatpush3.bf16.msra.mxu0 %v567_v27 }
  0x28   : > { %537 = vmatmul.mubr.f32.vlgmr.msra.gmra.mrb[0].mxu0 %v224_v28 }
  0x91   : > { %v355_v46 = vpop.permute.xlu1 %354 }
  0x95   : > { %v360_v48 = vpop.permute.xlu1 %359 }
  0xfb   : > { %v538_v32 = vpop.f32.mrb[0].mxu0 }
  0xfc   : > { %v314_v33 = vpop.f32.mrb[1].mxu0  ;;  %v320_v35 = vadd.f32 %v538_v32, %v483_v31 }
  0xfd   : > { %v315_v34 = vadd.f32 %v483_v31, %v314_v33 }
  0xfe   : > { %v331_v37 = vsel %vm327_vm0, %v320_v35, -1e+30  ;;  %v363_v49 = vadd.f32 %v360_v48, %v320_v35 }
  0xff   : > { %v330_v36 = vsel %vm327_vm0, %v315_v34, -1e+30  ;;  %v362_v47 = vadd.f32 %v355_v46, %v315_v34 }
 0x100   : > { %332 = vmax.xlane.f32.xlu0 %v330_v36  ;;  %v370_v51 = vrot.slane %v363_v49, 4 }
 0x101   : > { %v364_v50 = vrot.slane %v362_v47, 4 }
 0x102   : > { %v371_v53 = vmax.f32 %v363_v49, %v370_v51 }
 0x103   : > { %v365_v52 = vmax.f32 %v362_v47, %v364_v50 }
 0x104   : > { %334 = vmax.xlane.f32.xlu0 %v331_v37  ;;  %v372_v55 = vrot.slane %v371_v53, 2 }
 0x105   : > { %v366_v54 = vrot.slane %v365_v52, 2 }
 0x106   : > { %v373_v57 = vmax.f32 %v371_v53, %v372_v55 }
 0x107   : > { %v367_v56 = vmax.f32 %v365_v52, %v366_v54 }
 0x108   : > { %v374_v59 = vrot.slane %v373_v57, 1 }
 0x109   : > { %v368_v58 = vrot.slane %v367_v56, 1 }
 0x10a   : > { %v375_v61 = vmax.f32 %v373_v57, %v374_v59 }
 0x10b   : > { %v369_v60 = vmax.f32 %v367_v56, %v368_v58 }
 0x10c   : > { %v377_v63 = vsub.f32 %v363_v49, %v375_v61 }
 0x10d   : > { %v376_v62 = vsub.f32 %v362_v47, %v369_v60 }
 0x10e   : > { %v380_v1 = vmul.f32 1.442695, %v377_v63 }
 0x10f   : > { %v378_v0 = vmul.f32 1.442695, %v376_v62 }
 0x18d   : > { %v333_v38 = vpop.xlane.xlu0 %332 }
 0x18e   : > { %v712_v39 = vsub.f32 %v330_v36, %v333_v38 }
 0x190   : > { %v338_v40 = vmul.f32 1.442695, %v712_v39 }
 0x191   : > { %v335_v41 = vpop.xlane.xlu0 %334 }
 0x192   : > { %582 = vpow2.f32 %v338_v40  ;;  %v715_v42 = vsub.f32 %v331_v37, %v335_v41 }
 0x194   : > { %v340_v43 = vmul.f32 1.442695, %v715_v42 }
 0x196   : > { %584 = vpow2.f32 %v340_v43 }
 0x197   : > { %586 = vpow2.f32 %v378_v0 }
 0x198   : > { %588 = vpow2.f32 %v380_v1 }
 0x19c   : > { %v583_v44 = vpop.eup %582 }
 0x19d   : > { %342 = vadd.xlane.f32.xlu0 %v583_v44 }
 0x1a0   : > { %v585_v45 = vpop.eup %584 }
 0x1a1   : > { %344 = vadd.xlane.f32.xlu1 %v585_v45  ;;  %v587_v2 = vpop.eup %586 }
 0x1a2   : > { %v589_v3 = vpop.eup %588  ;;  %v382_v4 = vrot.slane %v587_v2, 4 }
 0x1a3   : > { %v388_v5 = vrot.slane %v589_v3, 4 }
 0x1a4   : > { %v383_v6 = vadd.f32 %v587_v2, %v382_v4 }
 0x1a5   : > { %v389_v7 = vadd.f32 %v589_v3, %v388_v5 }
 0x1a6   : > { %v384_v8 = vrot.slane %v383_v6, 2 }
 0x1a7   : > { %v390_v9 = vrot.slane %v389_v7, 2 }
 0x1a8   : > { %v385_v10 = vadd.f32 %v384_v8, %v383_v6 }
 0x1a9   : > { %v391_v11 = vadd.f32 %v390_v9, %v389_v7 }
 0x1aa   : > { %v386_v12 = vrot.slane %v385_v10, 1 }
 0x1ab   : > { %v392_v13 = vrot.slane %v391_v11, 1 }
 0x1ac   : > { %v387_v14 = vadd.f32 %v386_v12, %v385_v10 }
 0x1ad   : > { %v393_v15 = vadd.f32 %v392_v13, %v391_v11 }
 0x1ae   : > { %590 = vlog2.f32 %v387_v14 }
 0x1af   : > { %592 = vlog2.f32 %v393_v15 }
 0x1b8   : > { %v591_v18 = vpop.eup %590 }
 0x1b9   : > { %v593_v19 = vpop.eup %592  ;;  %v395_v20 = vmul.f32 0.6931472, %v591_v18 }
 0x1ba   : > { %v397_v24 = vmul.f32 0.6931472, %v593_v19 }
 0x1bb   : > { %v398_v23 = vsub.f32 %v376_v62, %v395_v20 }
 0x1bc   : > { %v399_v29 = vsub.f32 %v377_v63, %v397_v24 }
 0x22a   : > { %v343_v16 = vpop.xlane.xlu0 %342 }
 0x22b   : > { %594 = vlog2.f32 %v343_v16 }
 0x22e   : > { %v345_v17 = vpop.xlane.xlu1 %344 }
 0x22f   : > { %596 = vlog2.f32 %v345_v17 }
 0x235   : > { %v595_v21 = vpop.eup %594 }
 0x236   : > { %v347_v22 = vmul.f32 0.6931472, %v595_v21 }
 0x238   : > { %v350_v25 = vsub.f32 %v712_v39, %v347_v22 }
 0x239   : > { %v597_v26 = vpop.eup %596 }
 0x23a   : > { %v400_v27 = vsel %vm327_vm0, %v350_v25, %v398_v23  ;;  %v349_v28 = vmul.f32 0.6931472, %v597_v26 }
 0x23b   : > { %402 = vst [vmem:[%s221_s11] sm:$0xff] %v400_v27 }
 0x23c   : > { %v351_v31 = vsub.f32 %v715_v42, %v349_v28 }
 0x23e   : > { %v401_v32 = vsel %vm327_vm0, %v351_v31, %v399_v29 }
 0x23f   : > { %403 = vst [vmem:[%s221_s11 + $0x8] sm:$0xff] %v401_v32 }
 0x240 PF: > { %s14_s15 = sadd.s32 1, %s604_s15  }
 0x241   : > { %p11_p4 = scmp.ge.s32.totalorder %s14_s15, 4  }
 0x243   :  { %13 = sbr.rel (!%p11_p4) target bundleno = 1 (0x1), region = 69 }

</bundles_post_ra>
